<compile_context>
chip_gen: v6e
topology: v6e:2x2x1
jax: 0.10.0
libtpu: 0.0.40
codegen_flags: <defaults>
</compile_context>

<pallas_src>
import functools
import math
from typing import List, Sequence, Tuple

import jax
import jax.numpy as jnp
from jax.experimental import pallas as pl
from jax.experimental.pallas import tpu as pltpu


def _uniform_crop_offsets(height: int, width: int, size: int, spatial_idx: int):
    """Reproduces pytorchvideo/slowfast `uniform_crop` offset logic."""
    assert spatial_idx in (0, 1, 2)
    y_offset = int(math.ceil((height - size) / 2))
    x_offset = int(math.ceil((width - size) / 2))
    if height > width:
        if spatial_idx == 0:
            y_offset = 0
        elif spatial_idx == 2:
            y_offset = height - size
    else:
        if spatial_idx == 0:
            x_offset = 0
        elif spatial_idx == 2:
            x_offset = width - size
    return y_offset, x_offset


def _fused_crop_kernel(v_ref, *o_refs, windows: Tuple[Tuple[int, int], ...], size: int):
    # v_ref: (C, TB, H, W) frame block in VMEM (read from HBM once per step).
    # o_refs: one (C, TB, size, size) output block per crop window.
    # Each output is a single full-tile assignment of a static window slice.
    for o_ref, (y_off, x_off) in zip(o_refs, windows):
        o_ref[...] = v_ref[:, :, y_off:y_off + size, x_off:x_off + size]


def _pick_t_block(C, T, H, W, size, n_out, itemsize,
                  vmem_budget_bytes=16 * 1024 * 1024):
    """Largest divisor of T whose double-buffered working set (input block +
    all output blocks) fits the VMEM budget, while keeping >= 2 grid steps
    (so the v7x megacore still has a parallel axis to split)."""
    per_frame = C * (H * W + n_out * size * size) * itemsize
    tb_cap = max(1, vmem_budget_bytes // (2 * per_frame))  # x2: double-buffered
    best = 1
    for tb in range(1, T + 1):
        if T % tb != 0 or tb > tb_cap:
            continue
        if T >= 2 and T // tb < 2:
            continue
        best = max(best, tb)
    return best


def pallas_fused_uniform_crops(video: jax.Array, size: int,
                               windows: Sequence[Tuple[int, int]]) -> List[jax.Array]:
    """Crop (C, T, H, W) into len(windows) arrays of (C, T, size, size).

    All windows are produced from a single HBM read of the video (one fused
    pallas_call, T-blocked grid, one output per window)."""
    C, T, H, W = video.shape
    assert H >= size and W >= size, "crop_size must not exceed spatial dims"
    n_out = len(windows)
    tb = _pick_t_block(C, T, H, W, size, n_out, video.dtype.itemsize)

    kernel = functools.partial(_fused_crop_kernel, windows=tuple(windows), size=size)
    out_shape = tuple(jax.ShapeDtypeStruct((C, T, size, size), video.dtype)
                      for _ in range(n_out))
    out_specs = [pl.BlockSpec((C, tb, size, size), lambda t: (0, t, 0, 0))
                 for _ in range(n_out)]

    outs = pl.pallas_call(
        kernel,
        out_shape=out_shape,
        grid_spec=pltpu.PrefetchScalarGridSpec(
            num_scalar_prefetch=0,
            grid=(T // tb,),
            in_specs=[pl.BlockSpec((C, tb, H, W), lambda t: (0, t, 0, 0))],
            out_specs=out_specs,
        ),
        compiler_params=pltpu.CompilerParams(
            dimension_semantics=("parallel",),        # megacore split on v7x
            vmem_limit_bytes=32 * 1024 * 1024,        # safe on v5e/v6e/v7x
        ),
    )(video)
    return list(outs)


class SpatialCrop:
    """JAX/Pallas port of omnivision SpatialCrop. No learnable parameters."""

    def __init__(self, crop_size: int = 224, num_crops: int = 3):
        self.crop_size = crop_size
        if num_crops == 6:
            self.crops_to_ext = [0, 1, 2]
            self.flipped_crops_to_ext = [0, 1, 2]
        elif num_crops == 3:
            self.crops_to_ext = [0, 1, 2]
            self.flipped_crops_to_ext = []
        elif num_crops == 1:
            self.crops_to_ext = [1]
            self.flipped_crops_to_ext = []
        else:
            raise NotImplementedError(
                "Nothing else supported yet, slowfast only takes 0, 1, 2 as arguments"
            )

    def __call__(self, video: jax.Array) -> List[jax.Array]:
        assert video.ndim == 4, "Must be (C,T,H,W)"
        C, T, H, W = video.shape
        size = self.crop_size

        # Regular crop windows.
        windows = [_uniform_crop_offsets(H, W, size, idx) for idx in self.crops_to_ext]
        n_regular = len(windows)

        # Flipped crops: crop(hflip(video), y, x) == hflip(crop(video, y, W-size-x)).
        # Crop the mirrored window directly -> no full-video flip in HBM.
        for idx in self.flipped_crops_to_ext:
            y, x = _uniform_crop_offsets(H, W, size, idx)
            windows.append((y, W - size - x))

        outs = pallas_fused_uniform_crops(video, size, windows)

        res = outs[:n_regular]
        # TODO(synk): do this lane reversal inside the kernel (XLU slot is idle)
        # once lax.rev lowering in Mosaic is guaranteed; flipping only the small
        # crops here already avoids materialising a flipped copy of the video.
        res += [jnp.flip(o, axis=-1) for o in outs[n_regular:]]
        return res


# ---------------------------- pure-JAX reference ----------------------------

def _ref_uniform_crop(video, size, spatial_idx):
    _, _, H, W = video.shape
    y, x = _uniform_crop_offsets(H, W, size, spatial_idx)
    return video[:, :, y:y + size, x:x + size]


def _ref_spatial_crop(video, size, crops_to_ext, flipped_crops_to_ext):
    res = [_ref_uniform_crop(video, size, i) for i in crops_to_ext]
    if flipped_crops_to_ext:
        fv = jnp.flip(video, axis=-1)
        res += [_ref_uniform_crop(fv, size, i) for i in flipped_crops_to_ext]
    return res


if __name__ == "__main__":
    key = jax.random.PRNGKey(0)
    crop_size = 8

    # Wide frames (W > H): crops slide along width (left / center / right).
    C, T, H, W = 3, 4, 16, 20
    video_wide = jax.random.normal(key, (C, T, H, W), dtype=jnp.float32)
    # Tall frames (H > W): crops slide along height (top / center / bottom).
    video_tall = jax.random.normal(jax.random.PRNGKey(1), (C, T, 20, 16), dtype=jnp.float32)

    cases = [
        (video_wide, 1),
        (video_wide, 3),
        (video_wide, 6),
        (video_tall, 3),
    ]

    for vid, num_crops in cases:
        module = SpatialCrop(crop_size=crop_size, num_crops=num_crops)
        outs = module(vid)
        outs = [jax.block_until_ready(o) for o in outs]
        refs = _ref_spatial_crop(vid, crop_size, module.crops_to_ext,
                                 module.flipped_crops_to_ext)
        assert len(outs) == len(refs) == len(module.crops_to_ext) + len(module.flipped_crops_to_ext)
        for i, (out, ref) in enumerate(zip(outs, refs)):
            assert out.shape == (vid.shape[0], vid.shape[1], crop_size, crop_size), out.shape
            assert out.dtype == vid.dtype
            assert jnp.array_equal(out, ref), f"mismatch: num_crops={num_crops}, output {i}"

    print("KERNEL_OK")
</pallas_src>

<mosaic_0001>
module attributes {stable_mosaic.version = 11 : i64} {
  func.func @_fused_crop_kernel(%arg0: i32, %arg1: memref<3x2x16x20xf32, #tpu.memory_space<vmem>>, %arg2: memref<3x2x8x8xf32, #tpu.memory_space<vmem>>) attributes {dimension_semantics = [#tpu.dimension_semantics<parallel>], iteration_bounds = array<i64: 2>, scalar_prefetch = 0 : i64, scratch_operands = 0 : i64, tpu.core_type = #tpu.core_type<tc>, window_params = [{transform_indices = @transform_0, window_bounds = array<i64: 3, 2, 16, 20>}, {transform_indices = @transform_1, window_bounds = array<i64: 3, 2, 8, 8>}]} {
    %c0 = arith.constant 0 : index
    %c0_0 = arith.constant 0 : index
    %c4 = arith.constant 4 : index
    %c6 = arith.constant 6 : index
    %0 = vector.load %arg1[%c0, %c0_0, %c4, %c6] : memref<3x2x16x20xf32, #tpu.memory_space<vmem>>, vector<3x2x8x8xf32>
    %c0_1 = arith.constant 0 : index
    %c0_2 = arith.constant 0 : index
    %c0_3 = arith.constant 0 : index
    %c0_4 = arith.constant 0 : index
    %1 = vector.load %arg2[%c0_1, %c0_2, %c0_3, %c0_4] : memref<3x2x8x8xf32, #tpu.memory_space<vmem>>, vector<3x2x8x8xf32>
    tpu.vector_store %arg2[%c0_1, %c0_2, %c0_3, %c0_4], %0 {strides = array<i32>} : memref<3x2x8x8xf32, #tpu.memory_space<vmem>>, vector<3x2x8x8xf32>,
    return
  }
  func.func @transform_0(%arg0: i32) -> (i32, i32, i32, i32) {
    %c0_i32 = arith.constant 0 : i32
    %c0_i32_0 = arith.constant 0 : i32
    %c0_i32_1 = arith.constant 0 : i32
    %c0_i32_2 = arith.constant 0 : i32
    return %c0_i32, %arg0, %c0_i32_0, %c0_i32_1 : i32, i32, i32, i32
  }
  func.func @transform_1(%arg0: i32) -> (i32, i32, i32, i32) {
    %c0_i32 = arith.constant 0 : i32
    %c0_i32_0 = arith.constant 0 : i32
    %c0_i32_1 = arith.constant 0 : i32
    %c0_i32_2 = arith.constant 0 : i32
    return %c0_i32, %arg0, %c0_i32_0, %c0_i32_1 : i32, i32, i32, i32
  }
}

</mosaic_0001>

<bundles_post_ra>
// kernel: tpu_custom_call.1
= control target key start
LH: loop header
LB: loop body
LE: loop exit
PB: predicated region body
PF: predicated region fallthrough
CT: control target
= control target key end

     0   :  { %6 = vsyncpa [#allocation3], 0  ;;  %s590_s0 = inlined_call_operand.hbm [shape: f32[3,4,16,20], index: 0, kind: input, shape index: {}]   ;;  %s591_s1 = inlined_call_operand.hbm [shape: f32[3,4,8,8], index: 1, kind: output, shape index: {}]  }
   0x1   :  { %8 = vsyncpa [#allocation3 + $0x1], 0 }
   0x2   :  { %9 = vsyncpa [#allocation4], 0 }
   0x3   :  { %11 = vsyncpa [#allocation4 + $0x1], 0  ;;  %s461_s6 = smov 0   ;;  %s463_s7 = smov 0  }
   0x4   :  { %s465_s8 = smov 0   ;;  %s467_s9 = smov 0  }
   0x5 LB: > { %s482_s10 = sadd.s32 4294967295, %s435_s9   ;;  %s310_s11 = sadd.s32 4294967294, %s435_s9   ;;  %s435_s9 = sphi %s467_s9, %s599_s9   ;;  %s431_s8 = sphi %s465_s8, %s598_s8   ;;  %s427_s7 = sphi %s463_s7, %s597_s7   ;;  %s423_s6 = sphi %s461_s6, %s596_s6  }
   0x6   : > { %s486_s12 = sadd.s32 1, %s435_s9   ;;  %s24_s13 = sadd.s32 1, %s431_s8 }
   0x7   : > { %s21_s14 = ssub.s32 %s435_s9, %s486_s12  ;;  %p31_p0 = scmp.ne.s32.totalorder %s431_s8, %s427_s7 }
   0x8   : > { %p22_p1 = scmp.eq.s32.totalorder %s21_s14, 0  ;;  %p32_p2 = scmp.eq.s32.totalorder %s435_s9, 0 }
   0x9   : > { %p37_p3 = scmp.ne.s32.totalorder %s427_s7, %s423_s6  ;;  %p38_p4 = scmp.eq.s32.totalorder %s482_s10, 0 }
   0xa   : > { %s498_s15 = scalar_select %p22_p1, %s431_s8, %s24_s13  }
   0xb   : > { %p500_p5 = por %p32_p2, %p31_p0  ;;  %p504_p6 = por %p38_p4, %p37_p3 }
   0xc   : > { %p61_p7 = scmp.eq.s32.totalorder %s482_s10, 1  ;;  %p67_p8 = scmp.eq.s32.totalorder %s310_s11, 1 }
   0xd   : > { %p312_p11 = scmp.ge.s32.totalorder %s435_s9, 2 }
   0xe   : > { %p509_p9 = por %p61_p7, %p31_p0  ;;  %p513_p10 = por %p67_p8, %p37_p3 }
   0xf   : > { %83 = sbr.rel (%p312_p11) target bundleno = 34 (0x22), region = 16 }
  0x14   : > { %s87_s20 = sand.u32 1, %s431_s8   ;;  %s324_s22 = sshll.u32 %s435_s9, 9 }
  0x15   : > { %s326_s21 = smul.u32 96, %s87_s20  ;;  %s437_s23 = smov 1024  }
  0x16   : > { %330 = sst [smem:[#allocation7]] (%p500_p5), %s437_s23  ;;  %s98_s27 = scalar_lea.hbm %s590_s0, %s324_s22 }
  0x17   : > { %s329_s24 = scalar_select %p500_p5, [#allocation0], [#allocation10] }
  0x18   : > { %s91_s29 = scalar_lea.vmem [#allocation2], %s326_s21  ;;  %s438_s2 = smov 512  }
  0x19   : > { %s103_s28 = sld [smem:[%s329_s24]]   ;;  %s111_s30 = sshll.u32 %s91_s29, 4  ;;  %s112_s30 = int_to_ptr.vmem [resolvable:$true] %s111_s30 }
  0x1a   : > { %331 = sst [smem:[#allocation7 + $0x1]] (%p500_p5), %s438_s2  ;;  %s439_s3 = smov 4  }
  0x1b   : > { %332 = sst [smem:[#allocation7 + $0x2]] (%p500_p5), %s439_s3  ;;  %s440_s4 = smov 128  }
  0x1c   : > { %333 = sst [smem:[#allocation7 + $0x3]] (%p500_p5), %s440_s4  ;;  %s441_s5 = smov 8  }
  0x1d   : > { %334 = sst [smem:[#allocation7 + $0x4]] (%p500_p5), %s440_s4  ;;  %s88_s14 = scalar_lea.sflag [#allocation3], %s87_s20 }
  0x1e   : > { %335 = sst [smem:[#allocation7 + $0x5]] (%p500_p5), %s441_s5  ;;  %s442_s21 = smov 131072  }
  0x1f   : > { %s316_s11 = sshll.u32 %s103_s28, 26 }
  0x20   : > { %s317_s13 = sadd.s32 134217728, %s316_s11 }
  0x21   : > { %336 = dma.general (%p500_p5), %s98_s27, 1536, %s112_s30, %s88_s14, %s442_s21, [#allocation7], %s317_s13, 0  }
  0x22 PF: > { %p318_p12 = scmp.ge.s32.totalorder %s435_s9, 1  ;;  %p132_p13 = scmp.lt.s32.totalorder %s435_s9, 3 }
  0x24   : > { %p133_p0 = pnand %p318_p12, %p132_p13 }
  0x25   : > { %s544_s22 = sand.u32 (!%p133_p0), 1, %s427_s7  }
  0x26   : > { %136 = sbr.rel (%p133_p0) target bundleno = 179 (0xb3), region = 24  ;;  %s139_s24 = scalar_lea.sflag (!%p133_p0), [#allocation3], %s544_s22 }
  0x27   : > { %s327_s23 = smul.u32 (!%p133_p0), 96, %s544_s22 }
  0x29   : > { %s142_s25 = scalar_lea.vmem (!%p133_p0), [#allocation2], %s327_s23 }
  0x2b   : > { %414 = dma.done.wait (%p504_p6), %s139_s24, 1536  }
  0x2c   : > { %416 = vsyncadd (%p504_p6), %s139_s24, 4294965760  ;;  %v165_v0 = vld [vmem:[%s142_s25 + $0x24] sm:$0xff]  ;;  %s443_s16 = smov 122   ;;  %v166_v2 = vld [vmem:[%s142_s25 + $0x34] sm:$0xff]  ;;  %s328_s20 = smul.u32 48, %s544_s22  ;;  %vm193_vm0 = vcmask 64512  }
  0x2d   : > { %v163_v1 = vld [vmem:[%s142_s25 + $0x4] sm:$0xff]  ;;  %179 = vrot.lane.b32.xlu1 %v165_v0, %s443_s16  ;;  %v164_v3 = vld [vmem:[%s142_s25 + $0x14] sm:$0xff]  ;;  %s201_s26 = scalar_lea.sflag [#allocation4], %s544_s22 }
  0x2e   : > { %175 = vrot.lane.b32.xlu0 %v163_v1, %s443_s16  ;;  %v168_v4 = vld [vmem:[%s142_s25 + $0x54] sm:$0xff]  ;;  %v167_v5 = vld [vmem:[%s142_s25 + $0x44] sm:$0xff]  ;;  %s160_s17 = scalar_lea.vmem [#allocation5], %s328_s20 }
  0x31   : > { %181 = vrot.lane.b32.xlu1 %v166_v2, %s443_s16 }
  0x32   : > { %177 = vrot.lane.b32.xlu0 %v164_v3, %s443_s16 }
  0x35   : > { %185 = vrot.lane.b32.xlu1 %v168_v4, %s443_s16 }
  0x36   : > { %183 = vrot.lane.b32.xlu0 %v167_v5, %s443_s16 }
  0x9f   : > { %v180_v6 = vpop.permute.xlu1 %179 }
  0xa0   : > { %v176_v7 = vpop.permute.xlu0 %175  ;;  %196 = vst.msk [vmem:[%s160_s17 + $0x10] sm:$0xff] %vm193_vm0, %v180_v6 }
  0xa1   : > { %194 = vst.msk [vmem:[%s160_s17] sm:$0xff] %vm193_vm0, %v176_v7 }
  0xa3   : > { %v182_v8 = vpop.permute.xlu1 %181 }
  0xa4   : > { %v178_v9 = vpop.permute.xlu0 %177  ;;  %197 = vst.msk [vmem:[%s160_s17 + $0x18] sm:$0xff] %vm193_vm0, %v182_v8 }
  0xa5   : > { %195 = vst.msk [vmem:[%s160_s17 + $0x8] sm:$0xff] %vm193_vm0, %v178_v9 }
  0xa7   : > { %v186_v10 = vpop.permute.xlu1 %185 }
  0xa8   : > { %v184_v11 = vpop.permute.xlu0 %183  ;;  %199 = vst.msk [vmem:[%s160_s17 + $0x28] sm:$0xff] %vm193_vm0, %v186_v10 }
  0xa9   : > { %198 = vst.msk [vmem:[%s160_s17 + $0x20] sm:$0xff] %vm193_vm0, %v184_v11 }
  0xaa   : > { %s325_s27 = sshll.u32 %s482_s10, 8  ;;  %s224_s28 = sshll.u32 %s160_s17, 4  ;;  %s225_s28 = int_to_ptr.vmem [resolvable:$true] %s224_s28 }
  0xab   : > { %s213_s2 = scalar_lea.hbm %s591_s1, %s325_s27  ;;  %s444_s3 = smov 256  }
  0xac   : > { %338 = sst [smem:[#allocation9]] (%p509_p9), %s444_s3  ;;  %s445_s4 = smov 512  }
  0xad   : > { %339 = sst [smem:[#allocation9 + $0x1]] (%p509_p9), %s445_s4  ;;  %s446_s5 = smov 2  }
  0xae   : > { %340 = sst [smem:[#allocation9 + $0x2]] (%p509_p9), %s446_s5  ;;  %s447_s11 = smov 128  }
  0xaf   : > { %341 = sst [smem:[#allocation9 + $0x3]] (%p509_p9), %s447_s11  ;;  %s448_s10 = smov 8  }
  0xb0   : > { %342 = sst [smem:[#allocation9 + $0x4]] (%p509_p9), %s447_s11  ;;  %s449_s13 = smov 131072  }
  0xb1   : > { %343 = sst [smem:[#allocation9 + $0x5]] (%p509_p9), %s448_s10  ;;  %s450_s14 = smov 0  }
  0xb2   : > { %344 = dma.general (%p509_p9), %s225_s28, 768, %s213_s2, %s201_s26, %s449_s13, [#allocation9], %s450_s14, 0  }
  0xb3 PF: > { %s252_s21 = sand.u32 1, %s423_s6   ;;  %p347_p1 = pnand %p312_p11, %p513_p10 }
  0xb4   : > { %s253_s22 = scalar_lea.sflag [#allocation4], %s252_s21 }
  0xb5   : > { %p348_p2 = pneg %p347_p1 }
  0xb7   : > { %418 = dma.done.wait (%p348_p2), %s253_s22, 768  }
  0xb8   : > { %420 = vsyncadd (%p348_p2), %s253_s22, 4294966528  ;;  %p14_p3 = scmp.ge.s32.totalorder %s486_s12, 4   ;;  %s596_s6 = smov %s427_s7 }
  0xb9   : > { %s597_s7 = smov %s431_s8  ;;  %s598_s8 = smov %s498_s15 }
  0xba   : > { %s599_s9 = smov %s486_s12  ;;  %16 = sbr.rel (!%p14_p3) target bundleno = 5 (0x5), region = 79 }
  0xbf   :  { %258 = vsyncpa [#allocation3], 1 }
  0xc0   :  { %260 = vsyncpa [#allocation3 + $0x1], 1 }
  0xc1   :  { %261 = vsyncpa [#allocation4], 1 }
  0xc2   :  { %263 = vsyncpa [#allocation4 + $0x1], 1 }

</bundles_post_ra>
